<compile_context>
chip_gen: v5e
topology: v5e:2x2
jax: 0.10.0
libtpu: 0.0.40
codegen_flags: <defaults>
</compile_context>

<pallas_src>
import functools

import jax
import jax.numpy as jnp
from jax.experimental import pallas as pl
from jax.experimental.pallas import tpu as pltpu


def _round_up(x, m):
    return ((x + m - 1) // m) * m


# ----------------------------------------------------------------------------
# Pallas kernel 1: tiled matmul-accumulate over a taps axis, fused bias(+ReLU).
#   A: (T, M, K)  W: (T, K, N)  bias: (1, N)
#   out[m, n] = act( sum_t A[t, m, :] @ W[t, :, n] + bias[n] )
# Grid = (M/tm, N/tn, T); fp32 VMEM accumulator; bf16 MXU inputs.
# ----------------------------------------------------------------------------
def _matmul_acc_kernel(a_ref, w_ref, b_ref, o_ref, acc_ref, *, n_taps, relu):
    t = pl.program_id(2)

    @pl.when(t == 0)
    def _():
        acc_ref[...] = jnp.zeros_like(acc_ref)

    acc_ref[...] += jnp.dot(a_ref[0], w_ref[0], preferred_element_type=jnp.float32)

    @pl.when(t == n_taps - 1)
    def _():
        res = acc_ref[...] + b_ref[...]
        if relu:
            res = jnp.maximum(res, 0.0)
        o_ref[...] = res.astype(o_ref.dtype)


def pallas_matmul_acc(a, w, b, *, relu=False, out_dtype=jnp.bfloat16,
                      tm=128, tn=128):
    """a: (T, M, K), w: (T, K, N), b: (N,) -> (M, N) in out_dtype."""
    T, M, K = a.shape
    Tw, Kw, N = w.shape
    assert T == Tw and K == Kw

    tm = min(tm, _round_up(M, 8))          # sublane-aligned M tile
    tn = max(128, min(tn, _round_up(N, 128)))  # lane-dense N tile
    Mp = _round_up(M, tm)
    Np = _round_up(N, tn)

    a_p = jnp.zeros((T, Mp, K), jnp.bfloat16).at[:, :M, :].set(
        a.astype(jnp.bfloat16))
    w_p = jnp.zeros((T, K, Np), jnp.bfloat16).at[:, :, :N].set(
        w.astype(jnp.bfloat16))
    b_p = jnp.zeros((1, Np), jnp.float32).at[0, :N].set(b.astype(jnp.float32))

    out = pl.pallas_call(
        functools.partial(_matmul_acc_kernel, n_taps=T, relu=relu),
        out_shape=jax.ShapeDtypeStruct((Mp, Np), out_dtype),
        grid_spec=pltpu.PrefetchScalarGridSpec(
            num_scalar_prefetch=0,
            grid=(Mp // tm, Np // tn, T),
            in_specs=[
                pl.BlockSpec((1, tm, K), lambda i, j, t: (t, i, 0)),
                pl.BlockSpec((1, K, tn), lambda i, j, t: (t, 0, j)),
                pl.BlockSpec((1, tn), lambda i, j, t: (0, j)),
            ],
            out_specs=pl.BlockSpec((tm, tn), lambda i, j, t: (i, j)),
            scratch_shapes=[pltpu.VMEM((tm, tn), jnp.float32)],
        ),
        compiler_params=pltpu.CompilerParams(
            dimension_semantics=("parallel", "parallel", "arbitrary")
        ),
    )(a_p, w_p, b_p)
    return out[:M, :N]


# ----------------------------------------------------------------------------
# Pallas kernel 2: per-view bilinear unprojection (grid_sample as a matmul with
# a 4-sparse interpolation matrix) fused with the mean over views, tiled over
# the output points P.
#   feats : (B, N, C, HW)   wmat : (B, N, HW, P)   out : (B, C, P)
#   out[b, c, p] = (1/N) * sum_n sum_hw feats[b,n,c,hw] * wmat[b,n,hw,p]
# Grid = (B, P/tp, N); fp32 (C, tp) VMEM accumulator; bf16 MXU inputs.
# ----------------------------------------------------------------------------
def _unproj_mean_kernel(feat_ref, wmat_ref, o_ref, acc_ref, *, n_views):
    n = pl.program_id(2)

    @pl.when(n == 0)
    def _():
        acc_ref[...] = jnp.zeros_like(acc_ref)

    acc_ref[...] += jnp.dot(
        feat_ref[0, 0], wmat_ref[0, 0], preferred_element_type=jnp.float32
    )

    @pl.when(n == n_views - 1)
    def _():
        o_ref[0] = (acc_ref[...] * (1.0 / n_views)).astype(o_ref.dtype)


def pallas_unproject_mean(feats, wmat, *, tp=512, out_dtype=jnp.bfloat16):
    B, N, C, HW = feats.shape
    P = wmat.shape[-1]
    tp = max(128, min(tp, _round_up(P, 128)))
    Pp = _round_up(P, tp)

    f = feats.astype(jnp.bfloat16)
    w = jnp.zeros((B, N, HW, Pp), jnp.bfloat16).at[..., :P].set(
        wmat.astype(jnp.bfloat16))

    out = pl.pallas_call(
        functools.partial(_unproj_mean_kernel, n_views=N),
        out_shape=jax.ShapeDtypeStruct((B, C, Pp), out_dtype),
        grid_spec=pltpu.PrefetchScalarGridSpec(
            num_scalar_prefetch=0,
            grid=(B, Pp // tp, N),
            in_specs=[
                pl.BlockSpec((1, 1, C, HW), lambda b, p, n: (b, n, 0, 0)),
                pl.BlockSpec((1, 1, HW, tp), lambda b, p, n: (b, n, 0, p)),
            ],
            out_specs=pl.BlockSpec((1, C, tp), lambda b, p, n: (b, 0, p)),
            scratch_shapes=[pltpu.VMEM((C, tp), jnp.float32)],
        ),
        compiler_params=pltpu.CompilerParams(
            dimension_semantics=("parallel", "parallel", "arbitrary")
        ),
    )(f, w)
    return out[:, :, :P]


# ----------------------------------------------------------------------------
# JAX glue: geometry (get_warp_coordinates) and bilinear weight matrix.
# ----------------------------------------------------------------------------
def get_warp_coordinates(pts, warp_size, input_size, K, pose):
    """pts: (P,3) world verts; K: (B,N,3,3); pose: (B,N,3,4) -> (B,N,P,2) in [-1,1]."""
    ratio = warp_size / input_size
    scale = jnp.diag(jnp.array([ratio, ratio, 1.0], jnp.float32))
    proj = scale[None, None] @ K @ pose                      # (B,N,3,4)
    pts_h = jnp.concatenate(
        [pts, jnp.ones((pts.shape[0], 1), jnp.float32)], axis=-1
    )                                                        # (P,4)
    cam = jnp.einsum("bnij,pj->bnpi", proj, pts_h)           # (B,N,P,3)
    z = cam[..., 2:3]
    z = jnp.where(z < 1e-4, 1e-4, z)                         # matches div_val clamp
    xy = cam[..., :2] / z                                    # pixel coords (x, y)
    xy = xy / ((warp_size - 1) / 2.0) - 1.0                  # normalize, align_corners
    return xy


def build_bilinear_matrix(coords, H, W):
    """coords (B,N,P,2) normalized (x,y) -> interpolation matrix (B,N,HW,P).

    Exactly reproduces F.grid_sample(mode='bilinear', padding_mode='zeros',
    align_corners=True) as out = feat(C,HW) @ M(HW,P).  Built via a 4-entry
    scatter-add per point (no dense one_hot intermediates)."""
    B, N, P, _ = coords.shape
    x = (coords[..., 0] + 1.0) * 0.5 * (W - 1)
    y = (coords[..., 1] + 1.0) * 0.5 * (H - 1)
    x0 = jnp.floor(x)
    y0 = jnp.floor(y)
    wx = x - x0
    wy = y - y0
    x0i = x0.astype(jnp.int32)
    y0i = y0.astype(jnp.int32)

    idx_list, wts_list = [], []
    for dy, dx, wgt in (
        (0, 0, (1.0 - wy) * (1.0 - wx)),
        (0, 1, (1.0 - wy) * wx),
        (1, 0, wy * (1.0 - wx)),
        (1, 1, wy * wx),
    ):
        xi = x0i + dx
        yi = y0i + dy
        valid = ((xi >= 0) & (xi < W) & (yi >= 0) & (yi < H)).astype(jnp.float32)
        idx = jnp.clip(yi, 0, H - 1) * W + jnp.clip(xi, 0, W - 1)
        idx_list.append(idx)
        wts_list.append(wgt * valid)

    HW = H * W
    idx4 = jnp.stack(idx_list, -1).reshape(B * N * P, 4)
    wts4 = jnp.stack(wts_list, -1).reshape(B * N * P, 4)
    rows = jnp.broadcast_to(jnp.arange(B * N * P)[:, None], (B * N * P, 4))
    M = jnp.zeros((B * N * P, HW), jnp.float32).at[rows, idx4].add(wts4)
    M = M.reshape(B, N, P, HW)
    return jnp.swapaxes(M, -1, -2)                           # (B,N,HW,P)


def conv3d_relu(x, w, b, *, stride=2, pad=1):
    """Stride-2 Conv3d(k=3,p=1)+ReLU as 27 shifted matmuls accumulated in-kernel.

    x: (B,Cin,D,H,W) NCDHW; w: (Cout,Cin,kd,kh,kw); returns (B,Cout,Do,Ho,Wo)."""
    B, Cin, D, H, W = x.shape
    Cout, _, kd, kh, kw = w.shape
    Do = (D + 2 * pad - kd) // stride + 1
    Ho = (H + 2 * pad - kh) // stride + 1
    Wo = (W + 2 * pad - kw) // stride + 1
    xp = jnp.pad(x, ((0, 0), (0, 0), (pad, pad), (pad, pad), (pad, pad)))

    taps = []
    for i in range(kd):
        for j in range(kh):
            for k in range(kw):
                s = xp[
                    :, :,
                    i : i + stride * Do : stride,
                    j : j + stride * Ho : stride,
                    k : k + stride * Wo : stride,
                ]                                            # (B,Cin,Do,Ho,Wo)
                taps.append(s.transpose(0, 2, 3, 4, 1).reshape(B * Do * Ho * Wo, Cin))
    A = jnp.stack(taps, 0)                                   # (27, M, Cin)
    Wt = w.transpose(2, 3, 4, 1, 0).reshape(kd * kh * kw, Cin, Cout)

    out = pallas_matmul_acc(A, Wt, b, relu=True, out_dtype=jnp.bfloat16)
    return out.reshape(B, Do, Ho, Wo, Cout).transpose(0, 4, 1, 2, 3)


# ----------------------------------------------------------------------------
# The conditioner (scaled-down, deterministic parameters, lane-dense channels).
# ----------------------------------------------------------------------------
class MultiviewConditionerPallas:
    def __init__(
        self,
        input_image_size=56,          # small stand-in for 518 (must be /14)
        spatial_volume_size=8,        # small stand-in for 16
        spatial_volume_length=0.5,
        feat_dim=128,                 # small stand-in for 1024 (DINOv2 width)
        downsampler_dims=(128, 256),  # small stand-in for (512, 1024)
        in_channels=4,
        patch=14,
        seed=42,
    ):
        self.input_image_size = input_image_size
        self.V = spatial_volume_size
        self.L = spatial_volume_length
        self.patch = patch
        self.n_patch = input_image_size // patch
        self.feat_dim = feat_dim
        self.in_channels = in_channels
        self.dims = downsampler_dims

        key = jax.random.PRNGKey(seed)
        k1, k2, _ = jax.random.split(key, 3)
        patch_dim = in_channels * patch * patch
        self.w_embed = 0.02 * jax.random.normal(k1, (patch_dim, feat_dim), jnp.float32)
        self.b_embed = jnp.zeros((feat_dim,), jnp.float32)

        cin = feat_dim
        self.conv_w, self.conv_b = [], []
        for i, d in enumerate(downsampler_dims):
            kk = jax.random.fold_in(k2, i)
            self.conv_w.append(
                0.05 * jax.random.normal(kk, (d, cin, 3, 3, 3), jnp.float32)
            )
            self.conv_b.append(jnp.zeros((d,), jnp.float32))
            cin = d

    # --- synthetic encoder: patch tokens via the Pallas matmul kernel ---
    def _encode(self, images):
        B, N, C, H, W = images.shape
        np_, p = self.n_patch, self.patch
        x = images.reshape(B, N, C, np_, p, np_, p)
        x = x.transpose(0, 1, 3, 5, 2, 4, 6).reshape(B * N * np_ * np_, C * p * p)
        tok = pallas_matmul_acc(
            x[None], self.w_embed[None], self.b_embed, out_dtype=jnp.bfloat16
        )                                                              # (B*N*P, F)
        tok = tok.reshape(B, N, np_ * np_, self.feat_dim)
        return tok.transpose(0, 1, 3, 2)                               # (B,N,F,HW)

    def _volume_verts(self):
        V, L = self.V, self.L
        lin = jnp.linspace(-L, L, V, dtype=jnp.float32)
        g = jnp.stack(jnp.meshgrid(lin, lin, lin, indexing="ij"), axis=-1)
        return g.reshape(V ** 3, 3)[:, ::-1]                           # (P,3), cols (2,1,0)

    def construct_spatial_volume(self, images, extrinsics, intrinsics):
        B, N = images.shape[:2]
        V = self.V
        feats = self._encode(images)                                   # (B,N,F,HW)
        pts = self._volume_verts()                                     # (V^3,3)
        coords = get_warp_coordinates(
            pts, self.n_patch, self.input_image_size, intrinsics, extrinsics
        )                                                              # (B,N,P,2)
        wmat = build_bilinear_matrix(coords, self.n_patch, self.n_patch)
        vol = pallas_unproject_mean(feats, wmat)                       # (B,F,V^3)
        return vol.reshape(B, self.feat_dim, V, V, V)

    def __call__(self, images, extrinsics, intrinsics):
        vol = self.construct_spatial_volume(images, extrinsics[..., :3, :], intrinsics)
        x = vol
        for w, b in zip(self.conv_w, self.conv_b):
            x = conv3d_relu(x, w, b, stride=2, pad=1)
        B, C = x.shape[:2]
        flat = x.reshape(B, C, -1).transpose(0, 2, 1)                  # (B, V'^3, C)
        return flat.astype(jnp.float32)


# ----------------------------------------------------------------------------
# Deterministic example run.
# ----------------------------------------------------------------------------
def _make_cameras(B, N, img_size):
    # view 0: camera at (0,0,-2) looking along +z; view 1: rotated 90deg.
    R0 = jnp.eye(3, dtype=jnp.float32)
    t0 = jnp.array([0.0, 0.0, 2.0], jnp.float32)
    R1 = jnp.array([[0.0, 0.0, -1.0], [0.0, 1.0, 0.0], [1.0, 0.0, 0.0]], jnp.float32)
    t1 = jnp.array([0.0, 0.0, 2.0], jnp.float32)

    def ext(R, t):
        e = jnp.zeros((4, 4), jnp.float32).at[:3, :3].set(R).at[:3, 3].set(t)
        return e.at[3, 3].set(1.0)

    views = jnp.stack([ext(R0, t0), ext(R1, t1)], 0)[:N]               # (N,4,4)
    extr = jnp.broadcast_to(views[None], (B, N, 4, 4))
    f = 1.2 * img_size
    K = jnp.array(
        [[f, 0.0, img_size / 2.0], [0.0, f, img_size / 2.0], [0.0, 0.0, 1.0]],
        jnp.float32,
    )
    intr = jnp.broadcast_to(K[None, None], (B, N, 3, 3))
    return extr, intr


if __name__ == "__main__":
    B, N = 2, 2
    model = MultiviewConditionerPallas()
    H = W = model.input_image_size

    key = jax.random.PRNGKey(0)
    images = jax.random.normal(key, (B, N, model.in_channels, H, W), jnp.float32)
    extrinsics, intrinsics = _make_cameras(B, N, model.input_image_size)

    out = model(images, extrinsics, intrinsics)
    out = jax.block_until_ready(out)

    Vf = model.V // (2 ** len(model.dims))
    assert out.shape == (B, Vf ** 3, model.dims[-1]), out.shape
    assert bool(jnp.all(jnp.isfinite(out)))
    print("KERNEL_OK")
</pallas_src>

<mosaic_0001>
module attributes {stable_mosaic.version = 11 : i64} {
  func.func @_matmul_acc_kernel(%arg0: i32, %arg1: i32, %arg2: i32, %arg3: memref<1x64x784xbf16, #tpu.memory_space<vmem>>, %arg4: memref<1x784x128xbf16, #tpu.memory_space<vmem>>, %arg5: memref<1x128xf32, #tpu.memory_space<vmem>>, %arg6: memref<64x128xbf16, #tpu.memory_space<vmem>>, %arg7: memref<64x128xf32, #tpu.memory_space<vmem>>) attributes {dimension_semantics = [#tpu.dimension_semantics<parallel>, #tpu.dimension_semantics<parallel>, #tpu.dimension_semantics<arbitrary>], iteration_bounds = array<i64: 1, 1, 1>, scalar_prefetch = 0 : i64, scratch_operands = 1 : i64, tpu.core_type = #tpu.core_type<tc>, window_params = [{transform_indices = @transform_0, window_bounds = array<i64: 1, 64, 784>}, {transform_indices = @transform_1, window_bounds = array<i64: 1, 784, 128>}, {transform_indices = @transform_2, window_bounds = array<i64: 1, 128>}, {transform_indices = @transform_3, window_bounds = array<i64: 64, 128>}]} {
    %c0_i32 = arith.constant 0 : i32
    %0 = arith.cmpi eq, %arg2, %c0_i32 : i32
    %1 = arith.extui %0 : i1 to i32
    %c0_i32_0 = arith.constant 0 : i32
    %2 = arith.cmpi ne, %1, %c0_i32_0 : i32
    scf.if %2 {
      %cst_12 = arith.constant 0.000000e+00 : f32
      %14 = vector.broadcast %cst_12 : f32 to vector<64x128xf32>
      %c0_13 = arith.constant 0 : index
      %c0_14 = arith.constant 0 : index
      %15 = vector.load %arg7[%c0_13, %c0_14] : memref<64x128xf32, #tpu.memory_space<vmem>>, vector<64x128xf32>
      tpu.vector_store %arg7[%c0_13, %c0_14], %14 {strides = array<i32>} : memref<64x128xf32, #tpu.memory_space<vmem>>, vector<64x128xf32>,
    } else {
    }
    %c0 = arith.constant 0 : index
    %c0_1 = arith.constant 0 : index
    %3 = vector.load %arg7[%c0, %c0_1] : memref<64x128xf32, #tpu.memory_space<vmem>>, vector<64x128xf32>
    %c0_2 = arith.constant 0 : index
    %c0_3 = arith.constant 0 : index
    %c0_4 = arith.constant 0 : index
    %4 = vector.load %arg3[%c0_2, %c0_3, %c0_4] : memref<1x64x784xbf16, #tpu.memory_space<vmem>>, vector<1x64x784xbf16>
    %5 = vector.shape_cast %4 : vector<1x64x784xbf16> to vector<64x784xbf16>
    %c0_5 = arith.constant 0 : index
    %c0_6 = arith.constant 0 : index
    %c0_7 = arith.constant 0 : index
    %6 = vector.load %arg4[%c0_5, %c0_6, %c0_7] : memref<1x784x128xbf16, #tpu.memory_space<vmem>>, vector<1x784x128xbf16>
    %7 = vector.shape_cast %6 : vector<1x784x128xbf16> to vector<784x128xbf16>
    %cst = arith.constant dense<0.000000e+00> : vector<64x128xf32>
    %8 = tpu.matmul %5, %7, %cst {dimension_numbers = #tpu.dot_dimension_numbers<[1], [0], [0], [1], [0, 0, 1, 1], [], []>} : vector<64x784xbf16>, vector<784x128xbf16>, vector<64x128xf32> -> vector<64x128xf32>
    %9 = arith.addf %3, %8 : vector<64x128xf32>
    %c0_8 = arith.constant 0 : index
    %c0_9 = arith.constant 0 : index
    %10 = vector.load %arg7[%c0_8, %c0_9] : memref<64x128xf32, #tpu.memory_space<vmem>>, vector<64x128xf32>
    tpu.vector_store %arg7[%c0_8, %c0_9], %9 {strides = array<i32>} : memref<64x128xf32, #tpu.memory_space<vmem>>, vector<64x128xf32>,
    %c0_i32_10 = arith.constant 0 : i32
    %11 = arith.cmpi eq, %arg2, %c0_i32_10 : i32
    %12 = arith.extui %11 : i1 to i32
    %c0_i32_11 = arith.constant 0 : i32
    %13 = arith.cmpi ne, %12, %c0_i32_11 : i32
    scf.if %13 {
      %c0_12 = arith.constant 0 : index
      %c0_13 = arith.constant 0 : index
      %14 = vector.load %arg7[%c0_12, %c0_13] : memref<64x128xf32, #tpu.memory_space<vmem>>, vector<64x128xf32>
      %c0_14 = arith.constant 0 : index
      %c0_15 = arith.constant 0 : index
      %15 = vector.load %arg5[%c0_14, %c0_15] : memref<1x128xf32, #tpu.memory_space<vmem>>, vector<1x128xf32>
      %16 = vector.broadcast %15 : vector<1x128xf32> to vector<64x128xf32>
      %17 = arith.addf %14, %16 : vector<64x128xf32>
      %18 = arith.truncf %17 : vector<64x128xf32> to vector<64x128xbf16>
      %c0_16 = arith.constant 0 : index
      %c0_17 = arith.constant 0 : index
      %19 = vector.load %arg6[%c0_16, %c0_17] : memref<64x128xbf16, #tpu.memory_space<vmem>>, vector<64x128xbf16>
      tpu.vector_store %arg6[%c0_16, %c0_17], %18 {strides = array<i32>} : memref<64x128xbf16, #tpu.memory_space<vmem>>, vector<64x128xbf16>,
    } else {
    }
    return
  }
  func.func @transform_0(%arg0: i32, %arg1: i32, %arg2: i32) -> (i32, i32, i32) {
    %c0_i32 = arith.constant 0 : i32
    %c0_i32_0 = arith.constant 0 : i32
    return %arg2, %arg0, %c0_i32 : i32, i32, i32
  }
  func.func @transform_1(%arg0: i32, %arg1: i32, %arg2: i32) -> (i32, i32, i32) {
    %c0_i32 = arith.constant 0 : i32
    %c0_i32_0 = arith.constant 0 : i32
    return %arg2, %c0_i32, %arg1 : i32, i32, i32
  }
  func.func @transform_2(%arg0: i32, %arg1: i32, %arg2: i32) -> (i32, i32) {
    %c0_i32 = arith.constant 0 : i32
    %c0_i32_0 = arith.constant 0 : i32
    return %c0_i32, %arg1 : i32, i32
  }
  func.func @transform_3(%arg0: i32, %arg1: i32, %arg2: i32) -> (i32, i32) {
    %c0_i32 = arith.constant 0 : i32
    return %arg0, %arg1 : i32, i32
  }
}

</mosaic_0001>

<bundles_post_ra>
// kernel: tpu_custom_call.1
= control target key start
LH: loop header
LB: loop body
LE: loop exit
PB: predicated region body
PF: predicated region fallthrough
CT: control target
= control target key end

     0   :  { %8 = vsyncpa [#allocation4], 0  ;;  %s1513_s0 = inlined_call_operand.hbm [shape: bf16[1,64,784], index: 0, kind: input, shape index: {}]   ;;  %s1514_s1 = inlined_call_operand.hbm [shape: bf16[1,784,128], index: 1, kind: input, shape index: {}]   ;;  %s1515_s2 = inlined_call_operand.vmem [shape: f32[1,128], index: 2, kind: input, shape index: {}]   ;;  %s1516_s3 = inlined_call_operand.hbm [shape: bf16[64,128], index: 3, kind: output, shape index: {}]  }
   0x1   :  { %9 = vsyncpa [#allocation7], 0 }
   0x2   :  { %10 = vsyncpa [#allocation5], 0  ;;  %s15_s14 = sshll.u32 %s1513_s0, 4  ;;  %s1438_s15 = smov [#allocation3]   ;;  %s16_s14 = int_to_ptr.hbm [resolvable:$true] %s15_s14 }
   0x3   :  { %s17_s16 = sshll.u32 %s1438_s15, 4  ;;  %s28_s19 = sshll.u32 %s1514_s1, 4  ;;  %s18_s16 = int_to_ptr.vmem [resolvable:$true] %s17_s16  ;;  %s29_s19 = int_to_ptr.hbm [resolvable:$true] %s28_s19 }
   0x4   :  { %s1439_s20 = smov 448   ;;  %s1440_s21 = smov 28  }
   0x5   :  { %23 = dma.hbm_to_vmem [thread:$0]  %s16_s14, 3584, %s18_s16, [#allocation4], %s1439_s20, %s1439_s20, %s1440_s21  }
   0x6   :  { %s1441_s22 = smov [#allocation6]   ;;  %s1442_s24 = smov 64  }
   0x7   :  { %s30_s23 = sshll.u32 %s1441_s22, 4  ;;  %s1443_s25 = smov 4   ;;  %s31_s23 = int_to_ptr.vmem [resolvable:$true] %s30_s23 }
   0x8   :  { %36 = dma.hbm_to_vmem [thread:$0]  %s29_s19, 6272, %s31_s23, [#allocation7], %s1442_s24, %s1442_s24, %s1443_s25  }
   0x9   :  { %1432 = dma.done.wait [#allocation4], 3584  }
   0xa   :  { %1433 = vsyncadd [#allocation4], 4294963712 }
   0xb   :  { %1434 = dma.done.wait [#allocation7], 6272  }
   0xc   :  { %1435 = vsyncadd [#allocation7], 4294961024  ;;  %v1270_v0 = vld [vmem:[#allocation6 + $0x38] sm:$0xff]  ;;  %v1269_v3 = vld [vmem:[#allocation6 + $0x30] sm:$0xff]  ;;  %vm632_vm0 = vcmask 130048   ;;  %s909_s29 = sshll.u32 %s1516_s3, 4  ;;  %s910_s29 = int_to_ptr.hbm [resolvable:$true] %s909_s29 }
   0xd   :  { %v1278_v1 = vld [vmem:[#allocation6 + $0x78] sm:$0xff]  ;;  %645 = vmatpush.bf16.msra.mxu0 %v1270_v0  ;;  %1335 = vmatpush.bf16.msra.mxu3 %v1270_v0  ;;  %v1277_v4 = vld [vmem:[#allocation6 + $0x70] sm:$0xff]  ;;  %v1268_v6 = vld [vmem:[#allocation6 + $0x28] sm:$0xff] }
   0xe   :  { %v1286_v2 = vld [vmem:[#allocation6 + $0xb8] sm:$0xff]  ;;  %674 = vmatpush.bf16.msra.mxu1 %v1278_v1  ;;  %v1285_v5 = vld [vmem:[#allocation6 + $0xb0] sm:$0xff]  ;;  %v1276_v7 = vld [vmem:[#allocation6 + $0x68] sm:$0xff] }
   0xf   :  { %703 = vmatpush.bf16.msra.mxu2 %v1286_v2  ;;  %v1284_v8 = vld [vmem:[#allocation6 + $0xa8] sm:$0xff]  ;;  %v1267_v9 = vld [vmem:[#allocation6 + $0x20] sm:$0xff]  ;;  %v1266_v12 = vld [vmem:[#allocation6 + $0x18] sm:$0xff] }
  0x10   :  { %v1275_v10 = vld [vmem:[#allocation6 + $0x60] sm:$0xff]  ;;  %v1274_v13 = vld [vmem:[#allocation6 + $0x58] sm:$0xff]  ;;  %v1265_v15 = vld [vmem:[#allocation6 + $0x10] sm:$0xff] }
  0x11   :  { %646 = vmatpush.bf16.msra.mxu0 %v1269_v3  ;;  %1336 = vmatpush.bf16.msra.mxu3 %v1269_v3  ;;  %v1283_v11 = vld [vmem:[#allocation6 + $0xa0] sm:$0xff]  ;;  %v1282_v14 = vld [vmem:[#allocation6 + $0x98] sm:$0xff]  ;;  %v1273_v16 = vld [vmem:[#allocation6 + $0x50] sm:$0xff] }
  0x12   :  { %675 = vmatpush.bf16.msra.mxu1 %v1277_v4  ;;  %v1281_v17 = vld [vmem:[#allocation6 + $0x90] sm:$0xff]  ;;  %v1264_v18 = vld [vmem:[#allocation6 + $0x8] sm:$0xff]  ;;  %v1263_v21 = vld [vmem:[#allocation6] sm:$0xff] }
  0x13   :  { %704 = vmatpush.bf16.msra.mxu2 %v1285_v5  ;;  %v1272_v19 = vld [vmem:[#allocation6 + $0x48] sm:$0xff]  ;;  %v1271_v22 = vld [vmem:[#allocation6 + $0x40] sm:$0xff]  ;;  %v1238_v25 = vld [vmem:[#allocation3 + $0x18] sm:$0xf0] }
  0x14   :  { %v1280_v20 = vld [vmem:[#allocation6 + $0x88] sm:$0xff]  ;;  %v1279_v23 = vld [vmem:[#allocation6 + $0x80] sm:$0xff]  ;;  %v981_v26 = vld [vmem:[#allocation3 + $0x70] sm:$0xf] }
  0x15   :  { %647 = vmatpush.bf16.msra.mxu0 %v1268_v6  ;;  %1337 = vmatpush.bf16.msra.mxu3 %v1268_v6  ;;  %v925_v24 = vld [vmem:[#allocation3] sm:$0xf]  ;;  %v1252_v27 = vld [vmem:[#allocation3 + $0x88] sm:$0xf0]  ;;  %v1235_v28 = vld [vmem:[#allocation3 + $0x4] sm:$0xf] }
  0x16   :  { %676 = vmatpush.bf16.msra.mxu1 %v1276_v7  ;;  %v927_v29 = vld [vmem:[#allocation3 + $0x1c] sm:$0xf0]  ;;  %v933_v30 = vld [vmem:[#allocation3 + $0x8] sm:$0xf]  ;;  %v1239_v31 = vld [vmem:[#allocation3 + $0x20] sm:$0xf0]  ;;  %v926_v34 = vor.u32 %v1238_v25, %v925_v24  ;;  %v982_v35 = vor.u32 %v1252_v27, %v981_v26 }
  0x17   :  { %705 = vmatpush.bf16.msra.mxu2 %v1284_v8  ;;  %v1294_v32 = vld [vmem:[#allocation6 + $0xf8] sm:$0xff]  ;;  %v1474_v33 = vld [vmem:[#allocation6 + $0x180] sm:$0xff]  ;;  %v930_v36 = vor.u32 %v1235_v28, %v927_v29  ;;  %v934_v37 = vor.u32 %v1239_v31, %v933_v30  ;;  %v1293_v40 = vld [vmem:[#allocation6 + $0xf0] sm:$0xff] }
  0x18   :  { %v1302_v38 = vld [vmem:[#allocation6 + $0x138] sm:$0xff]  ;;  %v1301_v41 = vld [vmem:[#allocation6 + $0x130] sm:$0xff]  ;;  %v1292_v43 = vld [vmem:[#allocation6 + $0xe8] sm:$0xff] }
  0x19   :  { %648 = vmatpush.bf16.msra.mxu0 %v1267_v9  ;;  %1338 = vmatpush.bf16.msra.mxu3 %v1267_v9  ;;  %v1476_v39 = vld [vmem:[#allocation6 + $0x178] sm:$0xff]  ;;  %v1480_v42 = vld [vmem:[#allocation6 + $0x170] sm:$0xff]  ;;  %v1300_v44 = vld [vmem:[#allocation6 + $0x128] sm:$0xff] }
  0x1a   :  { %677 = vmatpush.bf16.msra.mxu1 %v1275_v10  ;;  %v1483_v45 = vld [vmem:[#allocation6 + $0x168] sm:$0xff]  ;;  %v1291_v46 = vld [vmem:[#allocation6 + $0xe0] sm:$0xff]  ;;  %v953_v48 = vld [vmem:[#allocation3 + $0x38] sm:$0xf] }
  0x1b   :  { %706 = vmatpush.bf16.msra.mxu2 %v1283_v11  ;;  %v1299_v47 = vld [vmem:[#allocation6 + $0x120] sm:$0xff]  ;;  %v1245_v49 = vld [vmem:[#allocation3 + $0x50] sm:$0xf0]  ;;  %v1009_v50 = vld [vmem:[#allocation3 + $0xa8] sm:$0xf] }
  0x1c   :  { %v1259_v51 = vld [vmem:[#allocation3 + $0xc0] sm:$0xf0]  ;;  %v1242_v52 = vld [vmem:[#allocation3 + $0x3c] sm:$0xf]  ;;  %v955_v53 = vld [vmem:[#allocation3 + $0x54] sm:$0xf0]  ;;  %v954_v58 = vor.u32 %v1245_v49, %v953_v48 }
  0x1d   :  { %649 = vmatpush.bf16.msra.mxu0 %v1266_v12  ;;  %1339 = vmatpush.bf16.msra.mxu3 %v1266_v12  ;;  %v961_v54 = vld [vmem:[#allocation3 + $0x40] sm:$0xf]  ;;  %v1246_v55 = vld [vmem:[#allocation3 + $0x58] sm:$0xf0]  ;;  %v1010_v59 = vor.u32 %v1259_v51, %v1009_v50  ;;  %v958_v60 = vor.u32 %v1242_v52, %v955_v53  ;;  %v1289_v0 = vld [vmem:[#allocation6 + $0xd0] sm:$0xff] }
  0x1e   :  { %678 = vmatpush.bf16.msra.mxu1 %v1274_v13  ;;  %v1486_v56 = vld [vmem:[#allocation6 + $0x160] sm:$0xff]  ;;  %v1290_v57 = vld [vmem:[#allocation6 + $0xd8] sm:$0xff]  ;;  %v962_v61 = vor.u32 %v1246_v55, %v961_v54  ;;  %v1297_v1 = vld [vmem:[#allocation6 + $0x110] sm:$0xff] }
  0x1f   :  { %707 = vmatpush.bf16.msra.mxu2 %v1282_v14  ;;  %v1298_v62 = vld [vmem:[#allocation6 + $0x118] sm:$0xff]  ;;  %v1305_v2 = vld [vmem:[#allocation6 + $0x150] sm:$0xff]  ;;  %v1288_v3 = vld [vmem:[#allocation6 + $0xc8] sm:$0xff] }
  0x20   :  { %v1306_v63 = vld [vmem:[#allocation6 + $0x158] sm:$0xff]  ;;  %v1296_v4 = vld [vmem:[#allocation6 + $0x108] sm:$0xff]  ;;  %v1287_v6 = vld [vmem:[#allocation6 + $0xc0] sm:$0xff] }
  0x21   :  { %650 = vmatpush.bf16.msra.mxu0 %v1265_v15  ;;  %1340 = vmatpush.bf16.msra.mxu3 %v1265_v15  ;;  %v1304_v5 = vld [vmem:[#allocation6 + $0x148] sm:$0xff]  ;;  %v1295_v7 = vld [vmem:[#allocation6 + $0x100] sm:$0xff]  ;;  %v1249_v8 = vld [vmem:[#allocation3 + $0x74] sm:$0xf] }
  0x22   :  { %679 = vmatpush.bf16.msra.mxu1 %v1273_v16  ;;  %v983_v9 = vld [vmem:[#allocation3 + $0x8c] sm:$0xf0]  ;;  %v1236_v10 = vld [vmem:[#allocation3 + $0xc] sm:$0xf]  ;;  %v935_v11 = vld [vmem:[#allocation3 + $0x24] sm:$0xf0] }
  0x23   :  { %708 = vmatpush.bf16.msra.mxu2 %v1281_v17  ;;  %v989_v12 = vld [vmem:[#allocation3 + $0x78] sm:$0xf]  ;;  %v1253_v13 = vld [vmem:[#allocation3 + $0x90] sm:$0xf0]  ;;  %v1303_v14 = vld [vmem:[#allocation6 + $0x140] sm:$0xff]  ;;  %v938_v17 = vor.u32 %v1236_v10, %v935_v11 }
  0x24   :  { %v941_v15 = vld [vmem:[#allocation3 + $0x10] sm:$0xf]  ;;  %v1240_v16 = vld [vmem:[#allocation3 + $0x28] sm:$0xf0]  ;;  %v1011_v24 = vld [vmem:[#allocation3 + $0xc4] sm:$0xf0] }
  0x25   :  { %651 = vmatpush.bf16.msra.mxu0 %v1264_v18  ;;  %1341 = vmatpush.bf16.msra.mxu3 %v1264_v18  ;;  %v986_v18 = vor.u32 %v1249_v8, %v983_v9  ;;  %v1017_v25 = vld [vmem:[#allocation3 + $0xb0] sm:$0xf]  ;;  %v1260_v26 = vld [vmem:[#allocation3 + $0xc8] sm:$0xf0]  ;;  %v969_v27 = vld [vmem:[#allocation3 + $0x48] sm:$0xf] }
  0x26   :  { %680 = vmatpush.bf16.msra.mxu1 %v1272_v19  ;;  %v990_v19 = vor.u32 %v1253_v13, %v989_v12  ;;  %v1247_v28 = vld [vmem:[#allocation3 + $0x60] sm:$0xf0]  ;;  %v1018_v31 = vor.u32 %v1260_v26, %v1017_v25  ;;  %v999_v48 = vld [vmem:[#allocation3 + $0x9c] sm:$0xf0]  ;;  %v977_v49 = vld [vmem:[#allocation3 + $0x50] sm:$0xf] }
  0x27   :  { %709 = vmatpush.bf16.msra.mxu2 %v1280_v20  ;;  %v942_v20 = vor.u32 %v1240_v16, %v941_v15  ;;  %v1248_v50 = vld [vmem:[#allocation3 + $0x68] sm:$0xf0]  ;;  %v1025_v51 = vld [vmem:[#allocation3 + $0xb8] sm:$0xf]  ;;  %v1261_v52 = vld [vmem:[#allocation3 + $0xd0] sm:$0xf0] }
  0x28   :  { %v978_v55 = vor.u32 %v1248_v50, %v977_v49 }
  0x29   :  { %652 = vmatpush.bf16.msra.mxu0 %v1263_v21  ;;  %1342 = vmatpush.bf16.msra.mxu3 %v1263_v21  ;;  %v1256_v21 = vld [vmem:[#allocation3 + $0xac] sm:$0xf] }
  0x2a   :  { %681 = vmatpush.bf16.msra.mxu1 %v1271_v22  ;;  %v1243_v22 = vld [vmem:[#allocation3 + $0x44] sm:$0xf]  ;;  %v1014_v30 = vor.u32 %v1256_v21, %v1011_v24 }
  0x2b   :  { %710 = vmatpush.bf16.msra.mxu2 %v1279_v23  ;;  %v963_v23 = vld [vmem:[#allocation3 + $0x5c] sm:$0xf0] }
  0x2c   :  { %653 = vmatmul.bf16.vlgmr.msra.gmra.mxu0 %v926_v34  ;;  %663 = vmatmul.bf16.vlgmr.msra.gmra.mxu3 %v982_v35  ;;  %v966_v29 = vor.u32 %v1243_v22, %v963_v23  ;;  %v991_v34 = vld [vmem:[#allocation3 + $0x94] sm:$0xf0]  ;;  %v1244_v35 = vld [vmem:[#allocation3 + $0x4c] sm:$0xf] }
  0x2d   :  { %732 = vmatpush.bf16.msrb.mxu3 %v1294_v32  ;;  %682 = vmatmul.bf16.vlgmr.msra.gmra.mxu1 %v930_v36  ;;  %v970_v32 = vor.u32 %v1247_v28, %v969_v27  ;;  %v971_v36 = vld [vmem:[#allocation3 + $0x64] sm:$0xf0] }
  0x2e   :  { %711 = vmatmul.bf16.vlgmr.msra.gmra.mxu2 %v934_v37  ;;  %761 = vmatpush.bf16.msrb.mxu0 %v1302_v38  ;;  %v949_v37 = vld [vmem:[#allocation3 + $0x18] sm:$0xf]  ;;  %v1241_v38 = vld [vmem:[#allocation3 + $0x30] sm:$0xf0] }
  0x2f   :  { %826 = vmatpush.bf16.msrb.mxu2 %v1474_v33  ;;  %1343 = vmatpush.bf16.msrb.mxu1 %v1476_v39 }
  0x31   :  { %733 = vmatpush.bf16.msrb.mxu3 %v1293_v40  ;;  %v1254_v40 = vld [vmem:[#allocation3 + $0x98] sm:$0xf0] }
  0x32   :  { %762 = vmatpush.bf16.msrb.mxu0 %v1301_v41 }
  0x33   :  { %1344 = vmatpush.bf16.msrb.mxu1 %v1480_v42 }
  0x35   :  { %734 = vmatpush.bf16.msrb.mxu3 %v1292_v43  ;;  %v950_v43 = vor.u32 %v1241_v38, %v949_v37 }
  0x36   :  { %763 = vmatpush.bf16.msrb.mxu0 %v1300_v44 }
  0x37   :  { %1345 = vmatpush.bf16.msrb.mxu1 %v1483_v45 }
  0x39   :  { %735 = vmatpush.bf16.msrb.mxu3 %v1291_v46  ;;  %v1019_v46 = vld [vmem:[#allocation3 + $0xcc] sm:$0xf0] }
  0x3a   :  { %764 = vmatpush.bf16.msrb.mxu0 %v1299_v47  ;;  %v1251_v47 = vld [vmem:[#allocation3 + $0x84] sm:$0xf] }
  0x3b   :  { %1346 = vmatpush.bf16.msrb.mxu1 %v1486_v56  ;;  %v1002_v54 = vor.u32 %v1251_v47, %v999_v48 }
  0x3c   :  { %658 = vmatmul.bf16.gmra.mxu0 %v954_v58  ;;  %668 = vmatmul.bf16.gmra.mxu3 %v1010_v59  ;;  %v1033_v58 = vld [vmem:[#allocation3 + $0xc0] sm:$0xf]  ;;  %v1262_v59 = vld [vmem:[#allocation3 + $0xd8] sm:$0xf0] }
  0x3d   :  { %736 = vmatpush.bf16.msrb.mxu3 %v1290_v57  ;;  %687 = vmatmul.bf16.gmra.mxu1 %v958_v60  ;;  %v1258_v57 = vld [vmem:[#allocation3 + $0xbc] sm:$0xf]  ;;  %v1027_v60 = vld [vmem:[#allocation3 + $0xd4] sm:$0xf0] }
  0x3e   :  { %716 = vmatmul.bf16.gmra.mxu2 %v962_v61  ;;  %765 = vmatpush.bf16.msrb.mxu0 %v1298_v62  ;;  %v1005_v61 = vld [vmem:[#allocation3 + $0x88] sm:$0xf]  ;;  %v1255_v62 = vld [vmem:[#allocation3 + $0xa0] sm:$0xf0] }
  0x3f   :  { %1347 = vmatpush.bf16.msrb.mxu1 %v1306_v63 }
  0x41   :  { %737 = vmatpush.bf16.msrb.mxu3 %v1289_v0  ;;  %v943_v0 = vld [vmem:[#allocation3 + $0x2c] sm:$0xf0] }
  0x42   :  { %766 = vmatpush.bf16.msrb.mxu0 %v1297_v1  ;;  %v1034_v1 = vor.u32 %v1262_v59, %v1033_v58 }
  0x43   :  { %1348 = vmatpush.bf16.msrb.mxu1 %v1305_v2 }
  0x45   :  { %738 = vmatpush.bf16.msrb.mxu3 %v1288_v3  ;;  %v1006_v3 = vor.u32 %v1255_v62, %v1005_v61 }
  0x46   :  { %767 = vmatpush.bf16.msrb.mxu0 %v1296_v4 }
  0x47   :  { %1349 = vmatpush.bf16.msrb.mxu1 %v1304_v5 }
  0x49   :  { %739 = vmatpush.bf16.msrb.mxu3 %v1287_v6 }
  0x4a   :  { %768 = vmatpush.bf16.msrb.mxu0 %v1295_v7 }
  0x4b   :  { %1350 = vmatpush.bf16.msrb.mxu1 %v1303_v14 }
  0x4c   :  { %740 = vmatmul.bf16.vlgmr.msrb.gmra.mxu3 %v938_v17 }
  0x4d   :  { %1351 = vmatpush.bf16.msra.mxu3 %v1474_v33  ;;  %692 = vmatmul.bf16.gmra.mxu1 %v986_v18  ;;  %v1250_v33 = vld [vmem:[#allocation3 + $0x7c] sm:$0xf] }
  0x4e   :  { %790 = vmatpush.bf16.msra.mxu0 %v1476_v39  ;;  %721 = vmatmul.bf16.gmra.mxu2 %v990_v19  ;;  %v997_v39 = vld [vmem:[#allocation3 + $0x80] sm:$0xf]  ;;  %v994_v41 = vor.u32 %v1250_v33, %v991_v34 }
  0x4f   :  { %769 = vmatmul.bf16.vlgmr.msrb.gmra.mxu0 %v942_v20  ;;  %v998_v44 = vor.u32 %v1254_v40, %v997_v39 }
  0x52   :  { %791 = vmatpush.bf16.msra.mxu0 %v1480_v42  ;;  %v974_v42 = vor.u32 %v1244_v35, %v971_v36 }
  0x56   :  { %792 = vmatpush.bf16.msra.mxu0 %v1483_v45  ;;  %v1257_v45 = vld [vmem:[#allocation3 + $0xb4] sm:$0xf] }
  0x57   :  { %v1022_v53 = vor.u32 %v1257_v45, %v1019_v46 }
  0x5a   :  { %793 = vmatpush.bf16.msra.mxu0 %v1486_v56  ;;  %v1026_v56 = vor.u32 %v1261_v52, %v1025_v51 }
  0x5c   :  { %745 = vmatmul.bf16.gmra.mxu3 %v966_v29 }
  0x5d   :  { %697 = vmatmul.bf16.gmra.mxu1 %v1014_v30 }
  0x5e   :  { %794 = vmatpush.bf16.msra.mxu0 %v1306_v63  ;;  %726 = vmatmul.bf16.gmra.mxu2 %v1018_v31  ;;  %v1237_v63 = vld [vmem:[#allocation3 + $0x14] sm:$0xf] }
  0x5f   :  { %774 = vmatmul.bf16.gmra.mxu0 %v970_v32  ;;  %v946_v4 = vor.u32 %v1237_v63, %v943_v0 }
  0x62   :  { %795 = vmatpush.bf16.msra.mxu0 %v1305_v2  ;;  %v1030_v2 = vor.u32 %v1258_v57, %v1027_v60 }
  0x66   :  { %796 = vmatpush.bf16.msra.mxu0 %v1304_v5 }
  0x6a   :  { %797 = vmatpush.bf16.msra.mxu0 %v1303_v14 }
  0x6c   :  { %750 = vmatmul.bf16.gmra.mxu3 %v994_v41 }
  0x6d   :  { %803 = vmatmul.bf16.vlgmr.msrb.gmra.mxu1 %v974_v42 }
  0x6e   :  { %1231 = vmatmul.msk.bf16.vlgmr.msrb.gmra.mxu2 %vm632_vm0, %v950_v43 }
  0x6f   :  { %779 = vmatmul.bf16.gmra.mxu0 %v998_v44 }
  0x7c   :  { %755 = vmatmul.bf16.gmra.mxu3 %v1022_v53 }
  0x7d   :  { %808 = vmatmul.bf16.gmra.mxu1 %v1002_v54 }
  0x7e   :  { %1232 = vmatmul.msk.bf16.gmra.mxu2 %vm632_vm0, %v978_v55 }
  0x7f   :  { %784 = vmatmul.bf16.gmra.mxu0 %v1026_v56 }
  0x8c   :  { %1234 = vmatmul.msk.bf16.vlgmr.msra.gmra.mxu3 %vm632_vm0, %v1034_v1 }
  0x8d   :  { %813 = vmatmul.bf16.gmra.mxu1 %v1030_v2 }
  0x8e   :  { %1233 = vmatmul.msk.bf16.gmra.mxu2 %vm632_vm0, %v1006_v3 }
  0x8f   :  { %798 = vmatmul.bf16.vlgmr.msra.gmra.mxu0 %v946_v4 }
  0xa9   :  { %v654_v5 = vpop.f32.mrf.mxu0 }
  0xaa   :  { %v683_v6 = vpop.f32.mrf.mxu1 }
  0xab   :  { %v684_v7 = vadd.f32 %v683_v6, %v654_v5  ;;  %v1359_v6 = vld [vmem:[%s1515_s2] ss:$0 sm:$0xff]  ;;  %s1444_s2 = smov [#allocation8]  }
  0xac   :  { %s907_s26 = sshll.u32 %s1444_s2, 4  ;;  %s908_s26 = int_to_ptr.vmem [resolvable:$true] %s907_s26 }
  0xaf   :  { %v664_v8 = vpop.f32.mrf.mxu3 }
  0xb1   :  { %v712_v9 = vpop.f32.mrf.mxu2  ;;  %v656_v11 = vpop.f32.mrf.mxu0 }
  0xb2   :  { %v713_v10 = vadd.f32 %v712_v9, %v684_v7  ;;  %v685_v12 = vpop.f32.mrf.mxu1 }
  0xb3   :  { %v686_v13 = vadd.f32 %v685_v12, %v656_v11 }
  0xb7   :  { %v1498_v14 = vpop.f32.mrf.mxu3 }
  0xb9   :  { %v714_v15 = vpop.f32.mrf.mxu2  ;;  %v659_v17 = vpop.f32.mrf.mxu0 }
  0xba   :  { %v1500_v16 = vadd.f32 %v714_v15, %v686_v13  ;;  %v688_v18 = vpop.f32.mrf.mxu1 }
  0xbb   :  { %v689_v19 = vadd.f32 %v688_v18, %v659_v17 }
  0xbf   :  { %v669_v20 = vpop.f32.mrf.mxu3 }
  0xc1   :  { %v717_v21 = vpop.f32.mrf.mxu2  ;;  %v661_v23 = vpop.f32.mrf.mxu0 }
  0xc2   :  { %v718_v22 = vadd.f32 %v717_v21, %v689_v19  ;;  %v690_v24 = vpop.f32.mrf.mxu1 }
  0xc3   :  { %v691_v57 = vadd.f32 %v690_v24, %v661_v23 }
  0xc7   :  { %v671_v25 = vpop.f32.mrf.mxu3 }
  0xc9   :  { %v719_v26 = vpop.f32.mrf.mxu2 }
  0xca   :  { %v693_v27 = vpop.f32.mrf.mxu1  ;;  %v720_v58 = vadd.f32 %v719_v26, %v691_v57 }
  0xcb   :  { %v694_v28 = vadd.f32 %v693_v27, %v664_v8 }
  0xcc   :  { %v770_v29 = vpop.f32.mrf.mxu0 }
  0xcf   :  { %v741_v30 = vpop.f32.mrf.mxu3 }
  0xd0   :  { %v742_v32 = vadd.f32 %v741_v30, %v713_v10 }
  0xd1   :  { %v722_v31 = vpop.f32.mrf.mxu2 }
  0xd2   :  { %v723_v33 = vadd.f32 %v722_v31, %v694_v28  ;;  %v695_v34 = vpop.f32.mrf.mxu1  ;;  %v771_v35 = vadd.f32 %v770_v29, %v742_v32 }
  0xd3   :  { %v696_v19 = vadd.f32 %v695_v34, %v1498_v14 }
  0xd4   :  { %v772_v36 = vpop.f32.mrf.mxu0 }
  0xd7   :  { %v743_v37 = vpop.f32.mrf.mxu3 }
  0xd9   :  { %v724_v38 = vpop.f32.mrf.mxu2 }
  0xda   :  { %v698_v39 = vpop.f32.mrf.mxu1  ;;  %v725_v26 = vadd.f32 %v724_v38, %v696_v19 }
  0xdb   :  { %v699_v10 = vadd.f32 %v698_v39, %v669_v20 }
  0xdc   :  { %v775_v40 = vpop.f32.mrf.mxu0 }
  0xdf   :  { %v746_v41 = vpop.f32.mrf.mxu3 }
  0xe0   :  { %v747_v59 = vadd.f32 %v746_v41, %v718_v22  ;;  %v744_v22 = vadd.f32 %v743_v37, %v1500_v16 }
  0xe1   :  { %v727_v42 = vpop.f32.mrf.mxu2 }
  0xe2   :  { %v700_v43 = vpop.f32.mrf.mxu1  ;;  %v776_v0 = vadd.f32 %v775_v40, %v747_v59  ;;  %v728_v17 = vadd.f32 %v727_v42, %v699_v10  ;;  %v773_v39 = vadd.f32 %v772_v36, %v744_v22 }
  0xe3   :  { %v701_v18 = vadd.f32 %v700_v43, %v671_v25 }
  0xe4   :  { %v777_v44 = vpop.f32.mrf.mxu0 }
  0xe7   :  { %v748_v45 = vpop.f32.mrf.mxu3 }
  0xe8   :  { %v749_v62 = vadd.f32 %v748_v45, %v720_v58 }
  0xe9   :  { %v729_v46 = vpop.f32.mrf.mxu2 }
  0xea   :  { %v804_v47 = vpop.f32.mrf.mxu1  ;;  %v778_v3 = vadd.f32 %v777_v44, %v749_v62  ;;  %v730_v23 = vadd.f32 %v729_v46, %v701_v18 }
  0xeb   :  { %v805_v2 = vadd.f32 %v804_v47, %v776_v0 }
  0xec   :  { %v780_v48 = vpop.f32.mrf.mxu0 }
  0xef   :  { %v751_v49 = vpop.f32.mrf.mxu3 }
  0xf0   :  { %v752_v27 = vadd.f32 %v751_v49, %v723_v33 }
  0xf1   :  { %v828_v50 = vpop.f32.mrf.mxu2 }
  0xf2   :  { %v806_v51 = vpop.f32.mrf.mxu1  ;;  %v781_v40 = vadd.f32 %v780_v48, %v752_v27 }
  0xf3   :  { %v807_v4 = vadd.f32 %v806_v51, %v778_v3 }
  0xf4   :  { %v782_v52 = vpop.f32.mrf.mxu0 }
  0xf7   :  { %v753_v53 = vpop.f32.mrf.mxu3 }
  0xf8   :  { %v754_v31 = vadd.f32 %v753_v53, %v725_v26 }
  0xf9   :  { %v830_v54 = vpop.f32.mrf.mxu2 }
  0xfa   :  { %v809_v55 = vpop.f32.mrf.mxu1  ;;  %v783_v37 = vadd.f32 %v782_v52, %v754_v31 }
  0xfb   :  { %v810_v16 = vadd.f32 %v809_v55, %v781_v40 }
  0xfc   :  { %v785_v56 = vpop.f32.mrf.mxu0 }
  0xff   :  { %v756_v60 = vpop.f32.mrf.mxu3 }
 0x100   :  { %v757_v24 = vadd.f32 %v756_v60, %v728_v17 }
 0x101   :  { %v833_v61 = vpop.f32.mrf.mxu2 }
 0x102   :  { %v811_v63 = vpop.f32.mrf.mxu1  ;;  %v834_v5 = vadd.f32 %v833_v61, %v805_v2  ;;  %v786_v32 = vadd.f32 %v785_v56, %v757_v24 }
 0x103   :  { %v812_v45 = vadd.f32 %v811_v63, %v783_v37 }
 0x104   :  { %v787_v1 = vpop.f32.mrf.mxu0  ;;  %v881_v12 = vadd.f32 %v1359_v6, %v834_v5 }
 0x107   :  { %v758_v7 = vpop.f32.mrf.mxu3 }
 0x108   :  { %v759_v29 = vadd.f32 %v758_v7, %v730_v23 }
 0x109   :  { %v835_v8 = vpop.f32.mrf.mxu2 }
 0x10a   :  { %v836_v9 = vadd.f32 %v835_v8, %v807_v4  ;;  %v814_v11 = vpop.f32.mrf.mxu1  ;;  %v788_v43 = vadd.f32 %v787_v1, %v759_v29 }
 0x10b   :  { %v815_v14 = vadd.f32 %v814_v11, %v786_v32 }
 0x10c   :  { %v882_v13 = vadd.f32 %v1359_v6, %v836_v9  ;;  %v799_v15 = vpop.f32.mrf.mxu0 }
 0x10d   :  { %v800_v30 = vadd.f32 %v799_v15, %v771_v35 }
 0x10e   :  { %v1320_v21 = vpack.c.bf16 %v882_v13, %v881_v12 }
 0x10f   :  { %v843_v28 = vpop.f32.mrf.mxu3  ;;  %v829_v42 = vadd.f32 %v828_v50, %v800_v30 }
 0x110   :  { %1332 = vst [vmem:[#allocation8 + $0x8] sm:$0xff] %v1320_v21   ;;  %v844_v44 = vadd.f32 %v843_v28, %v815_v14 }
 0x111   :  { %v838_v20 = vpop.f32.mrf.mxu2  ;;  %v879_v35 = vadd.f32 %v1359_v6, %v829_v42 }
 0x112   :  { %v816_v25 = vpop.f32.mrf.mxu1  ;;  %v839_v46 = vadd.f32 %v838_v20, %v810_v16  ;;  %v885_v48 = vadd.f32 %v1359_v6, %v844_v44 }
 0x113   :  { %v817_v33 = vadd.f32 %v816_v25, %v788_v43 }
 0x114   :  { %v801_v41 = vpop.f32.mrf.mxu0  ;;  %v883_v50 = vadd.f32 %v1359_v6, %v839_v46 }
 0x115   :  { %v802_v34 = vadd.f32 %v801_v41, %v773_v39 }
 0x117   :  { %v831_v38 = vadd.f32 %v830_v54, %v802_v34  ;;  %v845_v47 = vpop.f32.mrf.mxu3 }
 0x118   :  { %v846_v53 = vadd.f32 %v845_v47, %v817_v33 }
 0x119   :  { %v880_v49 = vadd.f32 %v1359_v6, %v831_v38  ;;  %v840_v51 = vpop.f32.mrf.mxu2 }
 0x11a   :  { %v841_v36 = vadd.f32 %v840_v51, %v812_v45  ;;  %v886_v57 = vadd.f32 %v1359_v6, %v846_v53 }
 0x11b   :  { %v1315_v56 = vpack.c.bf16 %v880_v49, %v879_v35 }
 0x11c   :  { %v884_v52 = vadd.f32 %v1359_v6, %v841_v36  ;;  %v1330_v54 = vpack.c.bf16 %v886_v57, %v885_v48 }
 0x11d   :  { %1316 = vst [vmem:[#allocation8] sm:$0xff] %v1315_v56  }
 0x11e   :  { %v1325_v55 = vpack.c.bf16 %v884_v52, %v883_v50  ;;  %1334 = vst [vmem:[#allocation8 + $0x18] sm:$0xff] %v1330_v54  }
 0x120   :  { %1333 = vst [vmem:[#allocation8 + $0x10] sm:$0xff] %v1325_v55  }
 0x121   :  { %915 = dma.vmem_to_hbm [thread:$0]  %s908_s26, 512, %s910_s29, [#allocation5], %s1442_s24, %s1442_s24, %s1443_s25  }
 0x122   :  { %1436 = dma.done.wait [#allocation5], 512  }
 0x123   :  { %1437 = vsyncadd [#allocation5], 4294966784 }
 0x124   :  { %920 = vsyncpa [#allocation4], 1 }
 0x125   :  { %921 = vsyncpa [#allocation7], 1 }
 0x126   :  { %922 = vsyncpa [#allocation5], 1 }

</bundles_post_ra>
